<compile_context>
chip_gen: v6e
topology: v6e:2x2x1
jax: 0.10.0
libtpu: 0.0.40
codegen_flags: <defaults>
</compile_context>

<pallas_src>
import functools

import numpy as np

import jax
import jax.numpy as jnp
from jax import lax
from jax.experimental import pallas as pl
from jax.experimental.pallas import tpu as pltpu


# ---------------------------------------------------------------- glue (JAX)
def _sub_filter_start_end(kernel_size, sub_kernel_size):
    center = kernel_size // 2
    dev = sub_kernel_size // 2
    return center - dev, center + dev + 1


def _get_same_padding(kernel_size):
    assert kernel_size % 2 == 1
    return kernel_size // 2


def get_active_filter(full_weight, kernel_size_list, kernel_size, transform_mats):
    """Replicates get_active_filter with KERNEL_TRANSFORM_MODE = 1.

    full_weight: (C, 1, Kmax, Kmax) depthwise conv weight (groups = C)
    returns:     (C, 1, kernel_size, kernel_size)
    """
    max_ks = max(kernel_size_list)
    ks_set = sorted(set(kernel_size_list))
    start, end = _sub_filter_start_end(max_ks, kernel_size)
    filters = full_weight[:, :, start:end, start:end]
    if kernel_size < max_ks:
        start_filter = full_weight
        for i in range(len(ks_set) - 1, 0, -1):
            src_ks = ks_set[i]
            if src_ks <= kernel_size:
                break
            target_ks = ks_set[i - 1]
            s, e = _sub_filter_start_end(src_ks, target_ks)
            inp = start_filter[:, :, s:e, s:e]
            inp = inp.reshape(inp.shape[0] * inp.shape[1], target_ks * target_ks)
            mat = transform_mats['%dto%d' % (src_ks, target_ks)]
            inp = inp @ mat.T                       # F.linear(x, M) = x @ M.T
            inp = inp.reshape(filters.shape[0], filters.shape[1],
                              target_ks, target_ks)
            start_filter = inp
        filters = start_filter
    return filters


# -------------------------------------------------------------- Pallas kernel
def _dwconv_bn_kernel(x_ref, m_ref, w_ref, b_ref, o_ref, xk_ref, *, K, W, L_out):
    """Depthwise conv + folded-BN epilogue on one (channel-block, H-strip)."""
    # x_ref : (1, 1, TC, L2)  H-padded strip, row-major flattened onto the lane
    #                         axis, plus K//2 zeros at each end of the flat axis.
    # m_ref : (K, L2)         per-kw column keep-masks (1.0 keep / 0.0 drop), f32.
    # w_ref : (TC, K*K)       depthwise taps with the BN scale pre-folded.
    # b_ref : (TC, 1)         folded BN bias.
    # o_ref : (1, 1, TC, L_out) output strip, flattened spatial on lanes.
    # xk_ref: (TC, L2) f32    scratch holding the column-masked input (per kw).
    p = K // 2
    x = x_ref[0, 0].astype(jnp.float32)                        # (TC, L2)
    acc = jnp.zeros((x.shape[0], L_out), jnp.float32)
    for kw in range(K):                                        # static -> unrolled
        if kw == p:
            xk_ref[...] = x
        else:
            # zero the flat positions whose source column would wrap into the
            # neighbouring image row ("same"-padding along W, done via mask).
            xk_ref[...] = x * m_ref[kw:kw + 1, :]
        for kh in range(K):
            s = kh * W + kw                                    # constant lane shift
            t = kh * K + kw
            wt = w_ref[:, t:t + 1].astype(jnp.float32)         # (TC, 1) per-channel tap
            acc = acc + xk_ref[:, s:s + L_out] * wt            # shift (XLU) + FMA (VPU)
    o_ref[0, 0] = (acc + b_ref[...].astype(jnp.float32)).astype(o_ref.dtype)


def _choose_strip_rows(H, W, TC, p, budget_bytes=2 << 20):
    """Largest H-strip (divisor of H) whose f32 input block fits the VMEM budget.

    The budget is sized against the smallest physical VMEM (v7x: 64 MiB) so that
    double-buffered input+output strips plus f32 scratch stay well under the
    scoped limit on every TPU generation.
    """
    rows = budget_bytes // (TC * W * 4)
    max_rows = max(1, rows - 2 * p)
    if H <= max_rows:
        return H
    best = 1
    for th in range(1, int(min(H, max_rows)) + 1):
        if H % th == 0:
            best = th
    return best


def dynamic_sepconv_bn_forward(x_nchw, full_weight, transform_mats,
                               kernel_size_list, kernel_size,
                               gamma, beta, running_mean, running_var,
                               eps=1e-5, stride=1, dilation=1,
                               storage_dtype=None, strip_rows=None):
    """Forward pass of DynamicSepConvBn2DNonFused (eval-mode BN, fp32 quant)."""
    assert stride == 1 and dilation == 1
    N, C, H, W = x_nchw.shape
    K = kernel_size
    p = _get_same_padding(K)
    assert W > p and H >= 1

    out_dtype = x_nchw.dtype

    # ---- parameter glue: dynamic kernel transform + BN folding (plain JAX) ----
    filters = get_active_filter(full_weight[:C, :, :, :], kernel_size_list,
                                kernel_size, transform_mats)          # (C,1,K,K)
    inv_std = 1.0 / jnp.sqrt(running_var[:C].astype(jnp.float32) + eps)
    scale = gamma[:C].astype(jnp.float32) * inv_std                   # (C,)
    bias = (beta[:C].astype(jnp.float32)
            - running_mean[:C].astype(jnp.float32) * scale)
    # fold the BN scale into the depthwise taps -> kernel epilogue is "+ bias"
    w2 = (filters[:, 0, :, :].astype(jnp.float32).reshape(C, K * K)
          * scale[:, None])                                           # (C, K*K)
    b2 = bias.reshape(C, 1)                                           # (C, 1)

    # ---- tiling choices ----
    TC = 8 if C % 8 == 0 else C              # channel block (sublane axis / grid)
    n_cblocks = C // TC
    if strip_rows is None:
        TH = _choose_strip_rows(H, W, TC, p)
    else:
        assert H % strip_rows == 0
        TH = strip_rows
    n_strips = H // TH
    Hs = TH + 2 * p                          # strip rows incl. halo / zero pad
    L_in = Hs * W
    L2 = L_in + 2 * p                        # flat strip + p zeros at both ends
    L_out = TH * W

    # ---- data prep: zero-pad H (+ halo strips) and flatten spatial onto lanes ----
    # NCHW is kept end-to-end (no NCHW<->NHWC transposes).
    x_work = x_nchw if storage_dtype is None else x_nchw.astype(storage_dtype)
    xp = jnp.pad(x_work, ((0, 0), (0, 0), (p, p), (0, 0)))            # (N,C,H+2p,W)
    if n_strips == 1:
        strips = xp[:, None]                                          # (N,1,C,Hs,W)
    else:
        strips = jnp.stack(
            [xp[:, :, i * TH:i * TH + Hs, :] for i in range(n_strips)], axis=1)
    x_flat = strips.reshape(N, n_strips, C, L_in)
    x_in = jnp.pad(x_flat, ((0, 0), (0, 0), (0, 0), (p, p)))          # (N,S,C,L2)

    # per-kw column keep-masks (static, built on host): zero the flat positions
    # whose source column would wrap into the neighbouring image row.
    col = (np.arange(L2) - p) % W
    m_np = np.ones((K, L2), np.float32)
    for kw in range(K):
        if kw < p:
            m_np[kw, col >= W - (p - kw)] = 0.0
        elif kw > p:
            m_np[kw, col < (kw - p)] = 0.0
    masks = jnp.asarray(m_np)

    # ---- explicit VMEM budget: 2x-buffered blocks + f32 scratch/accumulator ----
    in_bytes = TC * L2 * jnp.dtype(x_work.dtype).itemsize
    out_bytes = TC * L_out * jnp.dtype(out_dtype).itemsize
    misc_bytes = K * L2 * 4 + TC * K * K * 4 + TC * 4
    tmp_bytes = 2 * TC * L2 * 4 + 2 * TC * L_out * 4
    vmem_limit = int(min(64 << 20,
                         max(32 << 20,
                             2 * (in_bytes + out_bytes + misc_bytes)
                             + tmp_bytes + (2 << 20))))

    kernel = functools.partial(_dwconv_bn_kernel, K=K, W=W, L_out=L_out)
    out_flat = pl.pallas_call(
        kernel,
        out_shape=jax.ShapeDtypeStruct((N, n_strips, C, L_out), out_dtype),
        grid=(N, n_strips, n_cblocks),
        in_specs=[
            pl.BlockSpec((1, 1, TC, L2), lambda n, si, jc: (n, si, jc, 0)),
            pl.BlockSpec((K, L2), lambda n, si, jc: (0, 0)),
            pl.BlockSpec((TC, K * K), lambda n, si, jc: (jc, 0)),
            pl.BlockSpec((TC, 1), lambda n, si, jc: (jc, 0)),
        ],
        out_specs=pl.BlockSpec((1, 1, TC, L_out),
                               lambda n, si, jc: (n, si, jc, 0)),
        scratch_shapes=[pltpu.VMEM((TC, L2), jnp.float32)],
        compiler_params=pltpu.CompilerParams(
            dimension_semantics=("parallel", "parallel", "parallel"),
            vmem_limit_bytes=vmem_limit),
    )(x_in, masks, w2, b2)

    # un-flatten: free reshape when n_strips == 1, one repack pass otherwise.
    out = out_flat.reshape(N, n_strips, C, TH, W)
    out = jnp.transpose(out, (0, 2, 1, 3, 4)).reshape(N, C, H, W)
    return out


# ---------------------------------------------------------- pure-JAX reference
def _reference_forward(x_nchw, full_weight, transform_mats, kernel_size_list,
                       kernel_size, gamma, beta, running_mean, running_var,
                       eps=1e-5):
    N, C, H, W = x_nchw.shape
    filters = get_active_filter(full_weight[:C], kernel_size_list, kernel_size,
                                transform_mats)
    p = _get_same_padding(kernel_size)
    conv = lax.conv_general_dilated(
        x_nchw, filters, window_strides=(1, 1),
        padding=[(p, p), (p, p)], feature_group_count=C,
        dimension_numbers=('NCHW', 'OIHW', 'NCHW'))
    inv_std = 1.0 / jnp.sqrt(running_var[:C] + eps)
    scale = (gamma[:C] * inv_std).reshape(1, C, 1, 1)
    bias = (beta[:C] - running_mean[:C] * gamma[:C] * inv_std).reshape(1, C, 1, 1)
    return conv * scale + bias


if __name__ == "__main__":
    key = jax.random.PRNGKey(0)
    k1, k2, k3, k4, k5, k6 = jax.random.split(key, 6)

    max_in_channels = 4
    kernel_size_list = [3, 5, 7]
    active_kernel_size = 5          # exercises the 7->5 kernel-transform path
    N, C, H, W = 2, max_in_channels, 16, 16
    eps = 1e-5

    x = jax.random.normal(k1, (N, C, H, W), jnp.float32)

    # nn.Conv2d(C, C, 7, groups=C, bias=False) -> weight shape (C, 1, 7, 7)
    full_weight = jax.random.normal(k2, (max_in_channels, 1, 7, 7),
                                    jnp.float32) * 0.1
    # '%dto%d_matrix' parameters, initialized to identity as in __init__
    transform_mats = {
        '7to5': jnp.eye(25, dtype=jnp.float32),
        '5to3': jnp.eye(9, dtype=jnp.float32),
    }
    # nn.BatchNorm2d(C) affine params + running stats (eval-mode BN)
    gamma = 0.5 + jax.random.uniform(k3, (max_in_channels,), jnp.float32)
    beta = jax.random.normal(k4, (max_in_channels,), jnp.float32) * 0.1
    running_mean = jax.random.normal(k5, (max_in_channels,), jnp.float32) * 0.1
    running_var = 0.5 + jax.random.uniform(k6, (max_in_channels,), jnp.float32)

    ref = _reference_forward(
        x, full_weight, transform_mats, kernel_size_list, active_kernel_size,
        gamma, beta, running_mean, running_var, eps=eps)

    # 1) default path: single H-strip, f32 storage
    out = dynamic_sepconv_bn_forward(
        x, full_weight, transform_mats, kernel_size_list, active_kernel_size,
        gamma, beta, running_mean, running_var, eps=eps)
    out = jax.block_until_ready(out)
    assert out.shape == (N, C, H, W)
    assert jnp.allclose(out, ref, atol=1e-4, rtol=1e-4), "mismatch vs reference"

    # 2) H-strip tiling with halos (the path used when spatial dims are large)
    out_s = dynamic_sepconv_bn_forward(
        x, full_weight, transform_mats, kernel_size_list, active_kernel_size,
        gamma, beta, running_mean, running_var, eps=eps, strip_rows=8)
    out_s = jax.block_until_ready(out_s)
    assert jnp.allclose(out_s, ref, atol=1e-4, rtol=1e-4), "strip mismatch"

    # 3) bf16 storage (halved HBM/DMA traffic), f32 accumulation in-kernel
    out_b = dynamic_sepconv_bn_forward(
        x, full_weight, transform_mats, kernel_size_list, active_kernel_size,
        gamma, beta, running_mean, running_var, eps=eps,
        storage_dtype=jnp.bfloat16)
    out_b = jax.block_until_ready(out_b)
    assert jnp.allclose(out_b, ref, atol=5e-2, rtol=5e-2), "bf16 mismatch"

    print("KERNEL_OK")
</pallas_src>

<mosaic_0001>
module attributes {stable_mosaic.version = 11 : i64} {
  func.func @_dwconv_bn_kernel(%arg0: i32, %arg1: i32, %arg2: i32, %arg3: memref<1x1x4x324xf32, #tpu.memory_space<vmem>>, %arg4: memref<5x324xf32, #tpu.memory_space<vmem>>, %arg5: memref<4x25xf32, #tpu.memory_space<vmem>>, %arg6: memref<4x1xf32, #tpu.memory_space<vmem>>, %arg7: memref<1x1x4x256xf32, #tpu.memory_space<vmem>>, %arg8: memref<4x324xf32, #tpu.memory_space<vmem>>) attributes {dimension_semantics = [#tpu.dimension_semantics<parallel>, #tpu.dimension_semantics<parallel>, #tpu.dimension_semantics<parallel>], iteration_bounds = array<i64: 2, 1, 1>, scalar_prefetch = 0 : i64, scratch_operands = 1 : i64, tpu.core_type = #tpu.core_type<tc>, window_params = [{transform_indices = @transform_0, window_bounds = array<i64: 1, 1, 4, 324>}, {pipeline_mode = #tpu.pipeline_mode<synchronous>, transform_indices = @transform_1, window_bounds = array<i64: 5, 324>}, {transform_indices = @transform_2, window_bounds = array<i64: 4, 25>}, {transform_indices = @transform_3, window_bounds = array<i64: 4, 1>}, {transform_indices = @transform_4, window_bounds = array<i64: 1, 1, 4, 256>}]} {
    %c0 = arith.constant 0 : index
    %c0_0 = arith.constant 0 : index
    %c0_1 = arith.constant 0 : index
    %c0_2 = arith.constant 0 : index
    %0 = vector.load %arg3[%c0, %c0_0, %c0_1, %c0_2] : memref<1x1x4x324xf32, #tpu.memory_space<vmem>>, vector<1x1x4x324xf32>
    %1 = vector.shape_cast %0 : vector<1x1x4x324xf32> to vector<4x324xf32>
    %cst = arith.constant 0.000000e+00 : f32
    %2 = vector.broadcast %cst : f32 to vector<4x256xf32>
    %c0_3 = arith.constant 0 : index
    %c0_4 = arith.constant 0 : index
    %3 = vector.load %arg4[%c0_3, %c0_4] : memref<5x324xf32, #tpu.memory_space<vmem>>, vector<1x324xf32>
    %4 = vector.broadcast %3 : vector<1x324xf32> to vector<4x324xf32>
    %5 = arith.mulf %1, %4 : vector<4x324xf32>
    %c0_5 = arith.constant 0 : index
    %c0_6 = arith.constant 0 : index
    %6 = vector.load %arg8[%c0_5, %c0_6] : memref<4x324xf32, #tpu.memory_space<vmem>>, vector<4x324xf32>
    tpu.vector_store %arg8[%c0_5, %c0_6], %5 {strides = array<i32>} : memref<4x324xf32, #tpu.memory_space<vmem>>, vector<4x324xf32>,
    %c0_7 = arith.constant 0 : index
    %c0_8 = arith.constant 0 : index
    %7 = vector.load %arg5[%c0_7, %c0_8] : memref<4x25xf32, #tpu.memory_space<vmem>>, vector<4x1xf32>
    %c0_9 = arith.constant 0 : index
    %c0_10 = arith.constant 0 : index
    %8 = vector.load %arg8[%c0_9, %c0_10] : memref<4x324xf32, #tpu.memory_space<vmem>>, vector<4x256xf32>
    %9 = vector.broadcast %7 : vector<4x1xf32> to vector<4x256xf32>
    %10 = arith.mulf %8, %9 : vector<4x256xf32>
    %11 = arith.addf %2, %10 : vector<4x256xf32>
    %c0_11 = arith.constant 0 : index
    %c5 = arith.constant 5 : index
    %12 = vector.load %arg5[%c0_11, %c5] : memref<4x25xf32, #tpu.memory_space<vmem>>, vector<4x1xf32>
    %c0_12 = arith.constant 0 : index
    %c16 = arith.constant 16 : index
    %13 = vector.load %arg8[%c0_12, %c16] : memref<4x324xf32, #tpu.memory_space<vmem>>, vector<4x256xf32>
    %14 = vector.broadcast %12 : vector<4x1xf32> to vector<4x256xf32>
    %15 = arith.mulf %13, %14 : vector<4x256xf32>
    %16 = arith.addf %11, %15 : vector<4x256xf32>
    %c0_13 = arith.constant 0 : index
    %c10 = arith.constant 10 : index
    %17 = vector.load %arg5[%c0_13, %c10] : memref<4x25xf32, #tpu.memory_space<vmem>>, vector<4x1xf32>
    %c0_14 = arith.constant 0 : index
    %c32 = arith.constant 32 : index
    %18 = vector.load %arg8[%c0_14, %c32] : memref<4x324xf32, #tpu.memory_space<vmem>>, vector<4x256xf32>
    %19 = vector.broadcast %17 : vector<4x1xf32> to vector<4x256xf32>
    %20 = arith.mulf %18, %19 : vector<4x256xf32>
    %21 = arith.addf %16, %20 : vector<4x256xf32>
    %c0_15 = arith.constant 0 : index
    %c15 = arith.constant 15 : index
    %22 = vector.load %arg5[%c0_15, %c15] : memref<4x25xf32, #tpu.memory_space<vmem>>, vector<4x1xf32>
    %c0_16 = arith.constant 0 : index
    %c48 = arith.constant 48 : index
    %23 = vector.load %arg8[%c0_16, %c48] : memref<4x324xf32, #tpu.memory_space<vmem>>, vector<4x256xf32>
    %24 = vector.broadcast %22 : vector<4x1xf32> to vector<4x256xf32>
    %25 = arith.mulf %23, %24 : vector<4x256xf32>
    %26 = arith.addf %21, %25 : vector<4x256xf32>
    %c0_17 = arith.constant 0 : index
    %c20 = arith.constant 20 : index
    %27 = vector.load %arg5[%c0_17, %c20] : memref<4x25xf32, #tpu.memory_space<vmem>>, vector<4x1xf32>
    %c0_18 = arith.constant 0 : index
    %c64 = arith.constant 64 : index
    %28 = vector.load %arg8[%c0_18, %c64] : memref<4x324xf32, #tpu.memory_space<vmem>>, vector<4x256xf32>
    %29 = vector.broadcast %27 : vector<4x1xf32> to vector<4x256xf32>
    %30 = arith.mulf %28, %29 : vector<4x256xf32>
    %31 = arith.addf %26, %30 : vector<4x256xf32>
    %c1 = arith.constant 1 : index
    %c0_19 = arith.constant 0 : index
    %32 = vector.load %arg4[%c1, %c0_19] : memref<5x324xf32, #tpu.memory_space<vmem>>, vector<1x324xf32>
    %33 = vector.broadcast %32 : vector<1x324xf32> to vector<4x324xf32>
    %34 = arith.mulf %1, %33 : vector<4x324xf32>
    %c0_20 = arith.constant 0 : index
    %c0_21 = arith.constant 0 : index
    %35 = vector.load %arg8[%c0_20, %c0_21] : memref<4x324xf32, #tpu.memory_space<vmem>>, vector<4x324xf32>
    tpu.vector_store %arg8[%c0_20, %c0_21], %34 {strides = array<i32>} : memref<4x324xf32, #tpu.memory_space<vmem>>, vector<4x324xf32>,
    %c0_22 = arith.constant 0 : index
    %c1_23 = arith.constant 1 : index
    %36 = vector.load %arg5[%c0_22, %c1_23] : memref<4x25xf32, #tpu.memory_space<vmem>>, vector<4x1xf32>
    %c0_24 = arith.constant 0 : index
    %c1_25 = arith.constant 1 : index
    %37 = vector.load %arg8[%c0_24, %c1_25] : memref<4x324xf32, #tpu.memory_space<vmem>>, vector<4x256xf32>
    %38 = vector.broadcast %36 : vector<4x1xf32> to vector<4x256xf32>
    %39 = arith.mulf %37, %38 : vector<4x256xf32>
    %40 = arith.addf %31, %39 : vector<4x256xf32>
    %c0_26 = arith.constant 0 : index
    %c6 = arith.constant 6 : index
    %41 = vector.load %arg5[%c0_26, %c6] : memref<4x25xf32, #tpu.memory_space<vmem>>, vector<4x1xf32>
    %c0_27 = arith.constant 0 : index
    %c17 = arith.constant 17 : index
    %42 = vector.load %arg8[%c0_27, %c17] : memref<4x324xf32, #tpu.memory_space<vmem>>, vector<4x256xf32>
    %43 = vector.broadcast %41 : vector<4x1xf32> to vector<4x256xf32>
    %44 = arith.mulf %42, %43 : vector<4x256xf32>
    %45 = arith.addf %40, %44 : vector<4x256xf32>
    %c0_28 = arith.constant 0 : index
    %c11 = arith.constant 11 : index
    %46 = vector.load %arg5[%c0_28, %c11] : memref<4x25xf32, #tpu.memory_space<vmem>>, vector<4x1xf32>
    %c0_29 = arith.constant 0 : index
    %c33 = arith.constant 33 : index
    %47 = vector.load %arg8[%c0_29, %c33] : memref<4x324xf32, #tpu.memory_space<vmem>>, vector<4x256xf32>
    %48 = vector.broadcast %46 : vector<4x1xf32> to vector<4x256xf32>
    %49 = arith.mulf %47, %48 : vector<4x256xf32>
    %50 = arith.addf %45, %49 : vector<4x256xf32>
    %c0_30 = arith.constant 0 : index
    %c16_31 = arith.constant 16 : index
    %51 = vector.load %arg5[%c0_30, %c16_31] : memref<4x25xf32, #tpu.memory_space<vmem>>, vector<4x1xf32>
    %c0_32 = arith.constant 0 : index
    %c49 = arith.constant 49 : index
    %52 = vector.load %arg8[%c0_32, %c49] : memref<4x324xf32, #tpu.memory_space<vmem>>, vector<4x256xf32>
    %53 = vector.broadcast %51 : vector<4x1xf32> to vector<4x256xf32>
    %54 = arith.mulf %52, %53 : vector<4x256xf32>
    %55 = arith.addf %50, %54 : vector<4x256xf32>
    %c0_33 = arith.constant 0 : index
    %c21 = arith.constant 21 : index
    %56 = vector.load %arg5[%c0_33, %c21] : memref<4x25xf32, #tpu.memory_space<vmem>>, vector<4x1xf32>
    %c0_34 = arith.constant 0 : index
    %c65 = arith.constant 65 : index
    %57 = vector.load %arg8[%c0_34, %c65] : memref<4x324xf32, #tpu.memory_space<vmem>>, vector<4x256xf32>
    %58 = vector.broadcast %56 : vector<4x1xf32> to vector<4x256xf32>
    %59 = arith.mulf %57, %58 : vector<4x256xf32>
    %60 = arith.addf %55, %59 : vector<4x256xf32>
    %c0_35 = arith.constant 0 : index
    %c0_36 = arith.constant 0 : index
    %61 = vector.load %arg8[%c0_35, %c0_36] : memref<4x324xf32, #tpu.memory_space<vmem>>, vector<4x324xf32>
    tpu.vector_store %arg8[%c0_35, %c0_36], %1 {strides = array<i32>} : memref<4x324xf32, #tpu.memory_space<vmem>>, vector<4x324xf32>,
    %c0_37 = arith.constant 0 : index
    %c2 = arith.constant 2 : index
    %62 = vector.load %arg5[%c0_37, %c2] : memref<4x25xf32, #tpu.memory_space<vmem>>, vector<4x1xf32>
    %c0_38 = arith.constant 0 : index
    %c2_39 = arith.constant 2 : index
    %63 = vector.load %arg8[%c0_38, %c2_39] : memref<4x324xf32, #tpu.memory_space<vmem>>, vector<4x256xf32>
    %64 = vector.broadcast %62 : vector<4x1xf32> to vector<4x256xf32>
    %65 = arith.mulf %63, %64 : vector<4x256xf32>
    %66 = arith.addf %60, %65 : vector<4x256xf32>
    %c0_40 = arith.constant 0 : index
    %c7 = arith.constant 7 : index
    %67 = vector.load %arg5[%c0_40, %c7] : memref<4x25xf32, #tpu.memory_space<vmem>>, vector<4x1xf32>
    %c0_41 = arith.constant 0 : index
    %c18 = arith.constant 18 : index
    %68 = vector.load %arg8[%c0_41, %c18] : memref<4x324xf32, #tpu.memory_space<vmem>>, vector<4x256xf32>
    %69 = vector.broadcast %67 : vector<4x1xf32> to vector<4x256xf32>
    %70 = arith.mulf %68, %69 : vector<4x256xf32>
    %71 = arith.addf %66, %70 : vector<4x256xf32>
    %c0_42 = arith.constant 0 : index
    %c12 = arith.constant 12 : index
    %72 = vector.load %arg5[%c0_42, %c12] : memref<4x25xf32, #tpu.memory_space<vmem>>, vector<4x1xf32>
    %c0_43 = arith.constant 0 : index
    %c34 = arith.constant 34 : index
    %73 = vector.load %arg8[%c0_43, %c34] : memref<4x324xf32, #tpu.memory_space<vmem>>, vector<4x256xf32>
    %74 = vector.broadcast %72 : vector<4x1xf32> to vector<4x256xf32>
    %75 = arith.mulf %73, %74 : vector<4x256xf32>
    %76 = arith.addf %71, %75 : vector<4x256xf32>
    %c0_44 = arith.constant 0 : index
    %c17_45 = arith.constant 17 : index
    %77 = vector.load %arg5[%c0_44, %c17_45] : memref<4x25xf32, #tpu.memory_space<vmem>>, vector<4x1xf32>
    %c0_46 = arith.constant 0 : index
    %c50 = arith.constant 50 : index
    %78 = vector.load %arg8[%c0_46, %c50] : memref<4x324xf32, #tpu.memory_space<vmem>>, vector<4x256xf32>
    %79 = vector.broadcast %77 : vector<4x1xf32> to vector<4x256xf32>
    %80 = arith.mulf %78, %79 : vector<4x256xf32>
    %81 = arith.addf %76, %80 : vector<4x256xf32>
    %c0_47 = arith.constant 0 : index
    %c22 = arith.constant 22 : index
    %82 = vector.load %arg5[%c0_47, %c22] : memref<4x25xf32, #tpu.memory_space<vmem>>, vector<4x1xf32>
    %c0_48 = arith.constant 0 : index
    %c66 = arith.constant 66 : index
    %83 = vector.load %arg8[%c0_48, %c66] : memref<4x324xf32, #tpu.memory_space<vmem>>, vector<4x256xf32>
    %84 = vector.broadcast %82 : vector<4x1xf32> to vector<4x256xf32>
    %85 = arith.mulf %83, %84 : vector<4x256xf32>
    %86 = arith.addf %81, %85 : vector<4x256xf32>
    %c3 = arith.constant 3 : index
    %c0_49 = arith.constant 0 : index
    %87 = vector.load %arg4[%c3, %c0_49] : memref<5x324xf32, #tpu.memory_space<vmem>>, vector<1x324xf32>
    %88 = vector.broadcast %87 : vector<1x324xf32> to vector<4x324xf32>
    %89 = arith.mulf %1, %88 : vector<4x324xf32>
    %c0_50 = arith.constant 0 : index
    %c0_51 = arith.constant 0 : index
    %90 = vector.load %arg8[%c0_50, %c0_51] : memref<4x324xf32, #tpu.memory_space<vmem>>, vector<4x324xf32>
    tpu.vector_store %arg8[%c0_50, %c0_51], %89 {strides = array<i32>} : memref<4x324xf32, #tpu.memory_space<vmem>>, vector<4x324xf32>,
    %c0_52 = arith.constant 0 : index
    %c3_53 = arith.constant 3 : index
    %91 = vector.load %arg5[%c0_52, %c3_53] : memref<4x25xf32, #tpu.memory_space<vmem>>, vector<4x1xf32>
    %c0_54 = arith.constant 0 : index
    %c3_55 = arith.constant 3 : index
    %92 = vector.load %arg8[%c0_54, %c3_55] : memref<4x324xf32, #tpu.memory_space<vmem>>, vector<4x256xf32>
    %93 = vector.broadcast %91 : vector<4x1xf32> to vector<4x256xf32>
    %94 = arith.mulf %92, %93 : vector<4x256xf32>
    %95 = arith.addf %86, %94 : vector<4x256xf32>
    %c0_56 = arith.constant 0 : index
    %c8 = arith.constant 8 : index
    %96 = vector.load %arg5[%c0_56, %c8] : memref<4x25xf32, #tpu.memory_space<vmem>>, vector<4x1xf32>
    %c0_57 = arith.constant 0 : index
    %c19 = arith.constant 19 : index
    %97 = vector.load %arg8[%c0_57, %c19] : memref<4x324xf32, #tpu.memory_space<vmem>>, vector<4x256xf32>
    %98 = vector.broadcast %96 : vector<4x1xf32> to vector<4x256xf32>
    %99 = arith.mulf %97, %98 : vector<4x256xf32>
    %100 = arith.addf %95, %99 : vector<4x256xf32>
    %c0_58 = arith.constant 0 : index
    %c13 = arith.constant 13 : index
    %101 = vector.load %arg5[%c0_58, %c13] : memref<4x25xf32, #tpu.memory_space<vmem>>, vector<4x1xf32>
    %c0_59 = arith.constant 0 : index
    %c35 = arith.constant 35 : index
    %102 = vector.load %arg8[%c0_59, %c35] : memref<4x324xf32, #tpu.memory_space<vmem>>, vector<4x256xf32>
    %103 = vector.broadcast %101 : vector<4x1xf32> to vector<4x256xf32>
    %104 = arith.mulf %102, %103 : vector<4x256xf32>
    %105 = arith.addf %100, %104 : vector<4x256xf32>
    %c0_60 = arith.constant 0 : index
    %c18_61 = arith.constant 18 : index
    %106 = vector.load %arg5[%c0_60, %c18_61] : memref<4x25xf32, #tpu.memory_space<vmem>>, vector<4x1xf32>
    %c0_62 = arith.constant 0 : index
    %c51 = arith.constant 51 : index
    %107 = vector.load %arg8[%c0_62, %c51] : memref<4x324xf32, #tpu.memory_space<vmem>>, vector<4x256xf32>
    %108 = vector.broadcast %106 : vector<4x1xf32> to vector<4x256xf32>
    %109 = arith.mulf %107, %108 : vector<4x256xf32>
    %110 = arith.addf %105, %109 : vector<4x256xf32>
    %c0_63 = arith.constant 0 : index
    %c23 = arith.constant 23 : index
    %111 = vector.load %arg5[%c0_63, %c23] : memref<4x25xf32, #tpu.memory_space<vmem>>, vector<4x1xf32>
    %c0_64 = arith.constant 0 : index
    %c67 = arith.constant 67 : index
    %112 = vector.load %arg8[%c0_64, %c67] : memref<4x324xf32, #tpu.memory_space<vmem>>, vector<4x256xf32>
    %113 = vector.broadcast %111 : vector<4x1xf32> to vector<4x256xf32>
    %114 = arith.mulf %112, %113 : vector<4x256xf32>
    %115 = arith.addf %110, %114 : vector<4x256xf32>
    %c4 = arith.constant 4 : index
    %c0_65 = arith.constant 0 : index
    %116 = vector.load %arg4[%c4, %c0_65] : memref<5x324xf32, #tpu.memory_space<vmem>>, vector<1x324xf32>
    %117 = vector.broadcast %116 : vector<1x324xf32> to vector<4x324xf32>
    %118 = arith.mulf %1, %117 : vector<4x324xf32>
    %c0_66 = arith.constant 0 : index
    %c0_67 = arith.constant 0 : index
    %119 = vector.load %arg8[%c0_66, %c0_67] : memref<4x324xf32, #tpu.memory_space<vmem>>, vector<4x324xf32>
    tpu.vector_store %arg8[%c0_66, %c0_67], %118 {strides = array<i32>} : memref<4x324xf32, #tpu.memory_space<vmem>>, vector<4x324xf32>,
    %c0_68 = arith.constant 0 : index
    %c4_69 = arith.constant 4 : index
    %120 = vector.load %arg5[%c0_68, %c4_69] : memref<4x25xf32, #tpu.memory_space<vmem>>, vector<4x1xf32>
    %c0_70 = arith.constant 0 : index
    %c4_71 = arith.constant 4 : index
    %121 = vector.load %arg8[%c0_70, %c4_71] : memref<4x324xf32, #tpu.memory_space<vmem>>, vector<4x256xf32>
    %122 = vector.broadcast %120 : vector<4x1xf32> to vector<4x256xf32>
    %123 = arith.mulf %121, %122 : vector<4x256xf32>
    %124 = arith.addf %115, %123 : vector<4x256xf32>
    %c0_72 = arith.constant 0 : index
    %c9 = arith.constant 9 : index
    %125 = vector.load %arg5[%c0_72, %c9] : memref<4x25xf32, #tpu.memory_space<vmem>>, vector<4x1xf32>
    %c0_73 = arith.constant 0 : index
    %c20_74 = arith.constant 20 : index
    %126 = vector.load %arg8[%c0_73, %c20_74] : memref<4x324xf32, #tpu.memory_space<vmem>>, vector<4x256xf32>
    %127 = vector.broadcast %125 : vector<4x1xf32> to vector<4x256xf32>
    %128 = arith.mulf %126, %127 : vector<4x256xf32>
    %129 = arith.addf %124, %128 : vector<4x256xf32>
    %c0_75 = arith.constant 0 : index
    %c14 = arith.constant 14 : index
    %130 = vector.load %arg5[%c0_75, %c14] : memref<4x25xf32, #tpu.memory_space<vmem>>, vector<4x1xf32>
    %c0_76 = arith.constant 0 : index
    %c36 = arith.constant 36 : index
    %131 = vector.load %arg8[%c0_76, %c36] : memref<4x324xf32, #tpu.memory_space<vmem>>, vector<4x256xf32>
    %132 = vector.broadcast %130 : vector<4x1xf32> to vector<4x256xf32>
    %133 = arith.mulf %131, %132 : vector<4x256xf32>
    %134 = arith.addf %129, %133 : vector<4x256xf32>
    %c0_77 = arith.constant 0 : index
    %c19_78 = arith.constant 19 : index
    %135 = vector.load %arg5[%c0_77, %c19_78] : memref<4x25xf32, #tpu.memory_space<vmem>>, vector<4x1xf32>
    %c0_79 = arith.constant 0 : index
    %c52 = arith.constant 52 : index
    %136 = vector.load %arg8[%c0_79, %c52] : memref<4x324xf32, #tpu.memory_space<vmem>>, vector<4x256xf32>
    %137 = vector.broadcast %135 : vector<4x1xf32> to vector<4x256xf32>
    %138 = arith.mulf %136, %137 : vector<4x256xf32>
    %139 = arith.addf %134, %138 : vector<4x256xf32>
    %c0_80 = arith.constant 0 : index
    %c24 = arith.constant 24 : index
    %140 = vector.load %arg5[%c0_80, %c24] : memref<4x25xf32, #tpu.memory_space<vmem>>, vector<4x1xf32>
    %c0_81 = arith.constant 0 : index
    %c68 = arith.constant 68 : index
    %141 = vector.load %arg8[%c0_81, %c68] : memref<4x324xf32, #tpu.memory_space<vmem>>, vector<4x256xf32>
    %142 = vector.broadcast %140 : vector<4x1xf32> to vector<4x256xf32>
    %143 = arith.mulf %141, %142 : vector<4x256xf32>
    %144 = arith.addf %139, %143 : vector<4x256xf32>
    %c0_82 = arith.constant 0 : index
    %c0_83 = arith.constant 0 : index
    %145 = vector.load %arg6[%c0_82, %c0_83] : memref<4x1xf32, #tpu.memory_space<vmem>>, vector<4x1xf32>
    %146 = vector.broadcast %145 : vector<4x1xf32> to vector<4x256xf32>
    %147 = arith.addf %144, %146 : vector<4x256xf32>
    %c0_84 = arith.constant 0 : index
    %c0_85 = arith.constant 0 : index
    %c0_86 = arith.constant 0 : index
    %c0_87 = arith.constant 0 : index
    %148 = vector.load %arg7[%c0_84, %c0_85, %c0_86, %c0_87] : memref<1x1x4x256xf32, #tpu.memory_space<vmem>>, vector<1x1x4x256xf32>
    %149 = vector.shape_cast %148 : vector<1x1x4x256xf32> to vector<4x256xf32>
    %150 = vector.shape_cast %147 : vector<4x256xf32> to vector<1x1x4x256xf32>
    tpu.vector_store %arg7[%c0_84, %c0_85, %c0_86, %c0_87], %150 {strides = array<i32>} : memref<1x1x4x256xf32, #tpu.memory_space<vmem>>, vector<1x1x4x256xf32>,
    return
  }
  func.func @transform_0(%arg0: i32, %arg1: i32, %arg2: i32) -> (i32, i32, i32, i32) {
    %c0_i32 = arith.constant 0 : i32
    %c0_i32_0 = arith.constant 0 : i32
    return %arg0, %arg1, %arg2, %c0_i32 : i32, i32, i32, i32
  }
  func.func @transform_1(%arg0: i32, %arg1: i32, %arg2: i32) -> (i32, i32) {
    %c0_i32 = arith.constant 0 : i32
    %c0_i32_0 = arith.constant 0 : i32
    %c0_i32_1 = arith.constant 0 : i32
    return %c0_i32, %c0_i32_0 : i32, i32
  }
  func.func @transform_2(%arg0: i32, %arg1: i32, %arg2: i32) -> (i32, i32) {
    %c0_i32 = arith.constant 0 : i32
    %c0_i32_0 = arith.constant 0 : i32
    return %arg2, %c0_i32 : i32, i32
  }
  func.func @transform_3(%arg0: i32, %arg1: i32, %arg2: i32) -> (i32, i32) {
    %c0_i32 = arith.constant 0 : i32
    %c0_i32_0 = arith.constant 0 : i32
    return %arg2, %c0_i32 : i32, i32
  }
  func.func @transform_4(%arg0: i32, %arg1: i32, %arg2: i32) -> (i32, i32, i32, i32) {
    %c0_i32 = arith.constant 0 : i32
    %c0_i32_0 = arith.constant 0 : i32
    return %arg0, %arg1, %arg2, %c0_i32 : i32, i32, i32, i32
  }
}

</mosaic_0001>

<bundles_post_ra>
// kernel: tpu_custom_call.1
= control target key start
LH: loop header
LB: loop body
LE: loop exit
PB: predicated region body
PF: predicated region fallthrough
CT: control target
= control target key end

     0   :  { %s2025_s0 = inlined_call_operand.hbm [shape: f32[2,1,4,324], index: 0, kind: input, shape index: {}]   ;;  %s2026_s1 = inlined_call_operand.hbm [shape: f32[5,324], index: 1, kind: input, shape index: {}]   ;;  %s2027_s2 = inlined_call_operand.vmem [shape: f32[4,25], index: 2, kind: input, shape index: {}]   ;;  %s2028_s3 = inlined_call_operand.vmem [shape: f32[4,1], index: 3, kind: input, shape index: {}]   ;;  %s2029_s4 = inlined_call_operand.hbm [shape: f32[2,1,4,256], index: 4, kind: output, shape index: {}]  }
   0x1   :  { %2031 = sst [smem:[#allocation12_spill]] %s2026_s1 }
   0x2   :  { %9 = vsyncpa [#allocation4], 0 }
   0x3   :  { %11 = vsyncpa [#allocation4 + $0x1], 0 }
   0x4   :  { %12 = vsyncpa [#allocation7], 0 }
   0x5   :  { %13 = vsyncpa [#allocation5], 0 }
   0x6   :  { %15 = vsyncpa [#allocation5 + $0x1], 0  ;;  %s1594_s15 = smov 0   ;;  %s1596_s16 = smov 0  }
   0x7   :  { %s1598_s17 = smov 0   ;;  %s1600_s18 = smov 0  }
   0x8   :  { %s1602_s19 = smov 0   ;;  %s1604_s20 = smov 0  }
   0x9 LB: > { %s1208_s21 = sadd.s32 4294967295, %s1514_s20   ;;  %s1209_s22 = sadd.s32 4294967294, %s1514_s20   ;;  %s1514_s20 = sphi %s1604_s20, %s21_s20   ;;  %s1510_s19 = sphi %s1602_s19, %s2048_s19   ;;  %s1506_s18 = sphi %s1600_s18, %s2047_s18   ;;  %s1502_s17 = sphi %s1598_s17, %s2046_s17   ;;  %s1498_s16 = sphi %s1596_s16, %s2045_s16   ;;  %s1494_s15 = sphi %s1594_s15, %s2044_s15  }
   0xa   : > { %p64_p0 = scmp.ne.s32.totalorder %s1498_s16, %s1494_s15  ;;  %p1628_p1 = scmp.eq.s32.totalorder %s1208_s21, 0 }
   0xb   : > { %p1632_p2 = scmp.eq.s32.totalorder %s1208_s21, 1  ;;  %p171_p3 = scmp.eq.s32.totalorder %s1209_s22, 1 }
   0xc   : > { %p1638_p4 = por %p1628_p1, %p64_p0  ;;  %p1210_p5 = scmp.ge.s32.totalorder %s1514_s20, 1 }
   0xd   : > { %p1643_p6 = por %p171_p3, %p64_p0  ;;  %p178_p7 = scmp.lt.s32.totalorder %s1514_s20, 3 }
   0xe   : > { %s2034_s25 = scalar_select %p1638_p4, 1, 0 }
   0xf   : > { %s2035_s26 = scalar_select %p1643_p6, 1, 0 }
  0x10   : > { %p1648_p8 = pnand %p1210_p5, %p178_p7  ;;  %s1516_s28 = smov [#allocation6]  }
  0x11   : > { %s191_s29 = sshll.u32 %s1516_s28, 4  ;;  %s40_s5 = sadd.s32 1, %s1510_s19  ;;  %s192_s29 = int_to_ptr.vmem [resolvable:$true] %s191_s29 }
  0x12   : > { %p1236_p10 = pneg %p1648_p8  ;;  %s51_s6 = sadd.s32 1, %s1502_s17 }
  0x13   : > { %p42_p12 = scmp.ge.s32.totalorder %s40_s5, 2  ;;  %s1387_s7 = scalar_lea.vmem %s192_s29, 384 }
  0x14   : > { %p1657_p11 = pnand %p1236_p10, %p1628_p1  ;;  %p1388_p0 = scmp.ne.s32.totalorder %s192_s29, %s1387_s7 }
  0x15   : > { %p1395_p7 = scmp.lt.s32.totalorder %s192_s29, %s192_s29  ;;  %p1396_p6 = scmp.lt.s32.totalorder %s1387_s7, %s1387_s7 }
  0x16   : > { %p1378_p13 = pneg %p1657_p11 }
  0x17   : > { %p1397_p9 = por %p1396_p6, %p1395_p7 }
  0x18   : > { %p1390_p3 = pnand %p1388_p0, %p1378_p13 }
  0x1a   : > { %p1391_p5 = pneg %p1390_p3 }
  0x1c   : > { %p1398_p4 = pnand %p1397_p9, %p1391_p5 }
  0x1e   : > { %1401 = shalt.err (!%p1398_p4)
}
  0x1f   : > { %s2038_s1 = sld [smem:[#allocation12_spill]]  ;;  %s2050_s5 = smov (%p42_p12, %s40_s5), 0 }
  0x20   : > { %p58_p6 = scmp.ne.s32.totalorder %s1502_s17, %s1498_s16  ;;  %p59_p4 = scmp.eq.s32.totalorder %s1514_s20, 0 }
  0x21   : > { %s44_s10 = ssub.s32 %s1510_s19, %s2050_s5  ;;  %p1249_p9 = scmp.lt.s32.totalorder %s1514_s20, 2 }
  0x22   : > { %p49_p10 = scmp.eq.s32.totalorder %s44_s10, 0  ;;  %p60_p13 = por %p59_p4, %p58_p6 }
  0x23   : > { %p1680_p0 = por %p1632_p2, %p58_p6  ;;  %s216_s12 = sand.u32 1, %s1502_s17  }
  0x24   : > { %s1686_s13 = scalar_select %p49_p10, %s1502_s17, %s51_s6  }
  0x25   : > { %1239 = dma.hbm_to_vmem [thread:$0]  (!%p1657_p11), %s2038_s1, 384, %s192_s29, [#allocation7]  }
  0x26   : > { %s1225_s14 = smul.u32 12, %s216_s12  ;;  %p1689_p11 = pnand %p1249_p9, %p60_p13 }
  0x27   : > { %s1226_s21 = smul.u32 192, %s1510_s19  ;;  %s217_s8 = scalar_lea.sflag [#allocation4], %s216_s12 }
  0x28   : > { %s220_s7 = scalar_lea.vmem [#allocation3], %s1225_s14  ;;  %p1404_p2 = pneg %p1689_p11 }
  0x29   : > { %s230_s30 = scalar_lea.hbm %s2025_s0, %s1226_s21  ;;  %s232_s24 = sshll.u32 %s220_s7, 4  ;;  %s233_s24 = int_to_ptr.vmem [resolvable:$true] %s232_s24 }
  0x2a   : > { %s1415_s9 = scalar_lea.vmem %s233_s24, 192  ;;  %s1517_s6 = smov [#allocation3]  }
  0x2b   : > { %p1416_p12 = scmp.ne.s32.totalorder %s233_s24, %s1415_s9  ;;  %s1420_s10 = sshll.u32 %s1517_s6, 4  ;;  %s1421_s10 = int_to_ptr.vmem [resolvable:$false] %s1420_s10 }
  0x2c   : > { %s1422_s1 = scalar_lea.vmem %s1421_s10, 384  ;;  %p1423_p7 = scmp.lt.s32.totalorder %s233_s24, %s1421_s10 }
  0x2d   : > { %p1418_p3 = pnand %p1416_p12, %p1404_p2  ;;  %p1424_p6 = scmp.lt.s32.totalorder %s1422_s1, %s1415_s9 }
  0x2f   : > { %p1419_p5 = pneg %p1418_p3  ;;  %p1425_p4 = por %p1424_p6, %p1423_p7 }
  0x31   : > { %p1426_p9 = pnand %p1425_p4, %p1419_p5 }
  0x33   : > { %1429 = shalt.err (!%p1426_p9)
}
  0x34   : > { %1243 = dma.hbm_to_vmem [thread:$0]  (!%p1689_p11), %s230_s30, 192, %s233_s24, %s217_s8  }
  0x35   : > { %241 = sbr.rel (%p1648_p8) target bundleno = 431 (0x1af), region = 36  ;;  %s1703_s12 = sand.u32 (!%p1648_p8), 1, %s1498_s16  }
  0x36   : > { %s1227_s14 = smul.u32 (!%p1648_p8), 12, %s1703_s12  ;;  %s244_s21 = scalar_lea.sflag (!%p1648_p8), [#allocation4], %s1703_s12 }
  0x37   : > { %p2041_p10 = scmp.ne.s32.totalorder (!%p1648_p8), %s2034_s25, 0 }
  0x38   : > { %s1707_s28 = scalar_lea.vmem (!%p1648_p8), [#allocation3], %s1227_s14 }
  0x3a   : > { %1481 = dma.done.wait (%p2041_p10), %s244_s21, 192  }
  0x3b   : > { %1483 = vsyncadd (%p2041_p10), %s244_s21, 4294967104 }
  0x3c   : > { %1485 = dma.done.wait (%p1628_p1), [#allocation7], 384  }
  0x3d   : > { %1487 = vsyncadd (%p1628_p1), [#allocation7], 4294966912  ;;  %v1518_v0 = vmov 5   ;;  %v1519_v1 = vmov 10   ;;  %v296_v2 = vlaneseq  ;;  %v1720_v3 = vld [vmem:[%s2027_s2] sm:$0xf] }
  0x3e   : > { %1351 = vset.pattern.permute.xlu0 %v1518_v0  ;;  %1352 = vset.pattern.permute.xlu1 %v1519_v1  ;;  %v440_v5 = vld [vmem:[#allocation6 + $0x1] ss:$8 sm:$0x7]  ;;  %v294_v9 = vld [vmem:[#allocation6] ss:$8 sm:$0x7] }
  0x3f   : > { %335 = vperm.xlu0 %1351, %v1720_v3   ;;  %362 = vperm.xlu1 %1352, %v1720_v3   ;;  %v1724_v4 = vshrl.u32 %v296_v2, 7  ;;  %v1520_v10 = vmov 15   ;;  %v1521_v11 = vmov 20   ;;  %v1738_v14 = vld [vmem:[%s1707_s28 + $0x8] sm:$0xf]  ;;  %vm314_vm0 = vcmask 551936  }
  0x40   : > { %v461_v19 = vld [vmem:[%s2027_s2] sm:$0xf]  ;;  %v1522_v22 = vmov 1   ;;  %v1523_v23 = vmov 6   ;;  %v1524_v26 = vmov 11   ;;  %v1525_v27 = vmov 16  }
  0x41   : > { %v1727_v6 = vsub.s32 0, %v1724_v4  ;;  %v1730_v7 = vsub.s32 1, %v1724_v4  ;;  %v1733_v8 = vsub.s32 2, %v1724_v4  ;;  %v1526_v29 = vmov 21   ;;  %v597_v30 = vld [vmem:[%s2027_s2] sm:$0xf] }
  0x42   : > { %v1527_v31 = vmov 7   ;;  %v1528_v32 = vmov 2   ;;  %v1529_v33 = vmov 22   ;;  %v732_v35 = vld [vmem:[#allocation6 + $0x3] ss:$8 sm:$0x7] }
  0x43   : > { %1353 = vset.pattern.permute.xlu0 %v1520_v10  ;;  %1354 = vset.pattern.permute.xlu1 %v1521_v11  ;;  %v445_v12 = vrot.slane %v440_v5, %v1727_v6  ;;  %v449_v13 = vrot.slane %v440_v5, %v1730_v7  ;;  %v299_v15 = vrot.slane %v294_v9, %v1727_v6  ;;  %v1530_v40 = vmov 12   ;;  %v753_v41 = vld [vmem:[%s2027_s2] sm:$0xf]  ;;  %v888_v52 = vld [vmem:[#allocation6 + $0x4] ss:$8 sm:$0x7] }
  0x44   : > { %388 = vperm.xlu0 %1353, %v1720_v3   ;;  %414 = vperm.xlu1 %1354, %v1720_v3   ;;  %v303_v16 = vrot.slane %v294_v9, %v1730_v7  ;;  %v307_v17 = vrot.slane %v294_v9, %v1733_v8  ;;  %v453_v24 = vrot.slane %v440_v5, %v1733_v8  ;;  %v1531_v42 = vmov 13   ;;  %v909_v44 = vld [vmem:[%s2027_s2] sm:$0xf]  ;;  %v1787_v58 = vld [vmem:[%s1707_s28] sm:$0xff]  ;;  %s1544_s9 = smov 112   ;;  %s1545_s6 = smov 96  }
  0x45   : > { %v1745_v18 = vcombine.low %v445_v12, %v449_v13  ;;  %v737_v36 = vrot.slane %v732_v35, %v1727_v6  ;;  %v741_v37 = vrot.slane %v732_v35, %v1730_v7  ;;  %v745_v38 = vrot.slane %v732_v35, %v1733_v8  ;;  %s1546_s10 = smov 64   ;;  %s1547_s14 = smov 127  }
  0x46   : > { %v1750_v20 = vcombine.low %v299_v15, %v303_v16  ;;  %v312_v21 = vmul.f32 %v307_v17, %v1738_v14  ;;  %v458_v25 = vmul.f32 %v453_v24, %v1738_v14  ;;  %v1532_v46 = vmov 17   ;;  %s1548_s21 = smov 80   ;;  %s1549_s28 = smov 111  }
  0x47   : > { %v1769_v39 = vcombine.low %v737_v36, %v741_v37  ;;  %v750_v43 = vmul.f32 %v745_v38, %v1738_v14  ;;  %v1533_v47 = vmov 4   ;;  %v1534_v48 = vmov 3   ;;  %s1550_s1 = smov 95   ;;  %s1551_s27 = smov 79  }
  0x48   : > { %1355 = vset.pattern.permute.xlu0 %v1522_v22  ;;  %1356 = vset.pattern.permute.xlu1 %v1523_v23  ;;  %315 = vst.msk [vmem:[#allocation2 + $0x8] sm:$0xf] %vm314_vm0, %v312_v21  ;;  %v1535_v49 = vmov 19   ;;  %v1536_v50 = vmov 8   ;;  %v1537_v51 = vmov 0   ;;  %v893_v53 = vrot.slane %v888_v52, %v1727_v6  ;;  %s1552_s23 = smov 63  }
  0x49   : > { %466 = vperm.xlu0 %1355, %v461_v19   ;;  %492 = vperm.xlu1 %1356, %v461_v19   ;;  %v897_v54 = vrot.slane %v888_v52, %v1730_v7  ;;  %v901_v55 = vrot.slane %v888_v52, %v1733_v8  ;;  %v1538_v60 = vmov 18   ;;  %v1539_v62 = vmov 23   ;;  %s1553_s25 = smov 126   ;;  %s1554_s22 = smov 110  }
  0x4a   : > { %v1540_v63 = vmov 9   ;;  %v1541_v0 = vmov 14   ;;  %v1542_v1 = vmov 24   ;;  %v1543_v2 = vmov 839922192   ;;  %s1555_s29 = smov 94  }
  0x4b   : > { %v903_v56 = vcombine.low %v893_v53, %v897_v54  ;;  %v906_v57 = vmul.f32 %v901_v55, %v1738_v14  ;;  %v1800_v7 = vmul.f32 %v1750_v20, %v1787_v58  ;;  %s1556_s30 = smov 78   ;;  %s1557_s7 = smov 62   ;;  %vm355_vm1 = vcmask 1043456  }
  0x4c   : > { %s1558_s24 = smov 125   ;;  %s1559_s8 = smov 109   ;;  %vm357_vm2 = vcmask 916480   ;;  %vm383_vm3 = vcmask 785408   ;;  %vm409_vm4 = vcmask 654336   ;;  %vm435_vm5 = vcmask 523264  }
  0x4d   : > { %1357 = vset.pattern.permute.xlu1 %v1524_v26  ;;  %1358 = vset.pattern.permute.xlu0 %v1525_v27  ;;  %v1792_v61 = vmul.f32 %v903_v56, %v1787_v58  ;;  %vm487_vm6 = vcmask 1039360   ;;  %vm513_vm7 = vcmask 908288   ;;  %vm539_vm8 = vcmask 777216  }
  0x4e   : > { %518 = vperm.xlu1 %1357, %v461_v19   ;;  %544 = vperm.xlu0 %1358, %v461_v19   ;;  %vm565_vm9 = vcmask 646144   ;;  %vm591_vm10 = vcmask 515072   ;;  %vm623_vm11 = vcmask 1031168   ;;  %vm649_vm12 = vcmask 900096  }
  0x4f   : > { %v1756_v28 = vld [vmem:[#allocation2 + $0x8] sm:$0xf]  ;;  %vm675_vm13 = vcmask 769024   ;;  %vm701_vm14 = vcmask 637952   ;;  %vm727_vm15 = vcmask 506880  }
  0x50   : > { %460 = vst.msk [vmem:[#allocation2 + $0x8] sm:$0xf] %vm314_vm0, %v458_v25 }
  0x52   : > { %1359 = vset.pattern.permute.xlu1 %v1526_v29  ;;  %1361 = vset.pattern.permute.xlu0 %v1527_v31 }
  0x53   : > { %570 = vperm.xlu1 %1359, %v461_v19   ;;  %628 = vperm.xlu0 %1361, %v597_v30   ;;  %v457_v19 = vmul.f32 %v1745_v18, %v1787_v58 }
  0x57   : > { %1360 = vset.pattern.permute.xlu1 %v1528_v32  ;;  %1364 = vset.pattern.permute.xlu0 %v1529_v33  ;;  %v1762_v34 = vld [vmem:[#allocation2 + $0x8] sm:$0xf] }
  0x58   : > { %602 = vperm.xlu1 %1360, %v597_v30   ;;  %706 = vperm.xlu0 %1364, %v597_v30   ;;  %596 = vst.msk [vmem:[#allocation2 + $0x8] sm:$0xf] %vm314_vm0, %v1738_v14 }
  0x5c   : > { %1362 = vset.pattern.permute.xlu1 %v1530_v40  ;;  %1367 = vset.pattern.permute.xlu0 %v1531_v42 }
  0x5d   : > { %654 = vperm.xlu1 %1362, %v597_v30   ;;  %810 = vperm.xlu0 %1367, %v753_v41  }
  0x5f   : > { %v1778_v45 = vld [vmem:[#allocation2 + $0x8] sm:$0xf] }
  0x60   : > { %752 = vst.msk [vmem:[#allocation2 + $0x8] sm:$0xf] %vm314_vm0, %v750_v43 }
  0x61   : > { %1363 = vset.pattern.permute.xlu1 %v1532_v46  ;;  %1370 = vset.pattern.permute.xlu0 %v1533_v47 }
  0x62   : > { %680 = vperm.xlu1 %1363, %v597_v30   ;;  %914 = vperm.xlu0 %1370, %v909_v44  }
  0x66   : > { %1365 = vset.pattern.permute.xlu1 %v1534_v48  ;;  %1373 = vset.pattern.permute.xlu0 %v1535_v49 }
  0x67   : > { %758 = vperm.xlu1 %1365, %v753_v41   ;;  %992 = vperm.xlu0 %1373, %v909_v44   ;;  %v1789_v59 = vld [vmem:[#allocation2 + $0x8] sm:$0xf] }
  0x68   : > { %908 = vst.msk [vmem:[#allocation2 + $0x8] sm:$0xf] %vm314_vm0, %v906_v57  ;;  %vm779_vm0 = vcmask 1022976  }
  0x6b   : > { %1366 = vset.pattern.permute.xlu1 %v1536_v50  ;;  %1374 = vset.pattern.permute.xlu0 %v1537_v51 }
  0x6c   : > { %784 = vperm.xlu1 %1366, %v753_v41   ;;  %320 = vperm.xlu0 %1374, %v1720_v3   ;;  %v323_v3 = vunpack.c.l.s4 %v1543_v2  ;;  %v749_v2 = vmul.f32 %v1769_v39, %v1787_v58 }
  0x6e   : > { %v324_v5 = vunpack.c.0.s8 %v323_v3 }
  0x70   : > { %1368 = vset.pattern.permute.xlu1 %v1538_v60  ;;  %v1796_v6 = vsub.s32 %v324_v5, %v1724_v4 }
  0x71   : > { %836 = vperm.xlu1 %1368, %v753_v41  }
  0x75   : > { %1369 = vset.pattern.permute.xlu1 %v1539_v62 }
  0x76   : > { %862 = vperm.xlu1 %1369, %v753_v41  }
  0x7a   : > { %1371 = vset.pattern.permute.xlu1 %v1540_v63 }
  0x7b   : > { %940 = vperm.xlu1 %1371, %v909_v44  }
  0x7f   : > { %1372 = vset.pattern.permute.xlu1 %v1541_v0 }
  0x80   : > { %966 = vperm.xlu1 %1372, %v909_v44  }
  0x84   : > { %1375 = vset.pattern.permute.xlu1 %v1542_v1 }
  0x85   : > { %1018 = vperm.xlu1 %1375, %v909_v44  }
  0xba   : > { %v336_v8 = vpop.permute.xlu0 %335  ;;  %v363_v9 = vpop.permute.xlu1 %362 }
  0xbb   : > { %v343_v10 = vrot.slane %v336_v8, %v1796_v6  ;;  %v370_v11 = vrot.slane %v363_v9, %v1796_v6 }
  0xbd   : > { %v345_v12 = vmul.f32 %v343_v10, %v1800_v7  ;;  %v372_v13 = vmul.f32 %v370_v11, %v1800_v7  ;;  %v346_v16 = vmul.f32 %v343_v10, %v1756_v28  ;;  %v373_v20 = vmul.f32 %v370_v11, %v1756_v28 }
  0xbf   : > { %349 = vrot.lane.b32.xlu1 %v345_v12, %s1544_s9  ;;  %v415_v14 = vpop.permute.xlu1 %414  ;;  %v389_v15 = vpop.permute.xlu0 %388  ;;  %376 = vrot.lane.b32.xlu0 %v372_v13, %s1545_s6 }
  0xc0   : > { %v422_v4 = vrot.slane %v415_v14, %v1796_v6  ;;  %v396_v21 = vrot.slane %v389_v15, %v1796_v6 }
  0xc2   : > { %v424_v17 = vmul.f32 %v422_v4, %v1800_v7  ;;  %v398_v26 = vmul.f32 %v396_v21, %v1800_v7  ;;  %v399_v32 = vmul.f32 %v396_v21, %v1756_v28  ;;  %v425_v37 = vmul.f32 %v422_v4, %v1756_v28 }
  0xc3   : > { %351 = vrot.lane.b32.xlu1 %v346_v16, %s1544_s9  ;;  %s1560_s9 = smov 93  }
  0xc4   : > { %v467_v22 = vpop.permute.xlu0 %466  ;;  %428 = vrot.lane.b32.xlu0 %v424_v17, %s1546_s10  ;;  %v493_v23 = vpop.permute.xlu1 %492 }
  0xc5   : > { %v474_v24 = vrot.slane %v467_v22, %v1796_v6  ;;  %v500_v25 = vrot.slane %v493_v23, %v1796_v6 }
  0xc7   : > { %v476_v27 = vmul.f32 %v474_v24, %v457_v19  ;;  %378 = vrot.lane.b32.xlu1 %v373_v20, %s1545_s6  ;;  %v502_v29 = vmul.f32 %v500_v25, %v457_v19  ;;  %v477_v41 = vmul.f32 %v474_v24, %v1762_v34  ;;  %v503_v28 = vmul.f32 %v500_v25, %v1762_v34  ;;  %s1561_s6 = smov 77  }
  0xc9   : > { %480 = vrot.lane.b32.xlu0 %v476_v27, %s1547_s14  ;;  %v519_v18 = vpop.permute.xlu1 %518  ;;  %v545_v31 = vpop.permute.xlu0 %544 }
  0xca   : > { %v526_v30 = vrot.slane %v519_v18, %v1796_v6  ;;  %v552_v35 = vrot.slane %v545_v31, %v1796_v6 }
  0xcb   : > { %402 = vrot.lane.b32.xlu1 %v398_v26, %s1548_s21 }
  0xcc   : > { %v528_v33 = vmul.f32 %v526_v30, %v457_v19  ;;  %v554_v38 = vmul.f32 %v552_v35, %v457_v19  ;;  %v529_v50 = vmul.f32 %v526_v30, %v1762_v34  ;;  %v555_v54 = vmul.f32 %v552_v35, %v1762_v34 }
  0xcd   : > { %506 = vrot.lane.b32.xlu0 %v502_v29, %s1549_s28 }
  0xce   : > { %v571_v36 = vpop.permute.xlu1 %570  ;;  %v629_v46 = vpop.permute.xlu0 %628 }
  0xcf   : > { %404 = vrot.lane.b32.xlu1 %v399_v32, %s1548_s21  ;;  %v578_v40 = vrot.slane %v571_v36, %v1796_v6  ;;  %v636_v49 = vrot.slane %v629_v46, %v1796_v6  ;;  %s1564_s21 = smov 108  }
  0xd1   : > { %532 = vrot.lane.b32.xlu0 %v528_v33, %s1550_s1  ;;  %v580_v43 = vmul.f32 %v578_v40, %v457_v19  ;;  %v638_v51 = vmul.f32 %v636_v49, %v1787_v58  ;;  %v581_v62 = vmul.f32 %v578_v40, %v1762_v34  ;;  %v639_v34 = vmul.f32 %v636_v49, %v1778_v45 }
  0xd3   : > { %430 = vrot.lane.b32.xlu1 %v425_v37, %s1546_s10  ;;  %v603_v42 = vpop.permute.xlu1 %602  ;;  %v707_v57 = vpop.permute.xlu0 %706  ;;  %s1562_s10 = smov 61  }
  0xd4   : > { %v610_v44 = vrot.slane %v603_v42, %v1796_v6  ;;  %v714_v0 = vrot.slane %v707_v57, %v1796_v6  ;;  %v1043_v42 = vld [vmem:[%s2028_s3] sm:$0xf] }
  0xd5   : > { %558 = vrot.lane.b32.xlu0 %v554_v38, %s1551_s27  ;;  %v911_v38 = vld [vmem:[#allocation2 + $0x8] sm:$0xf] }
  0xd6   : > { %v612_v48 = vmul.f32 %v610_v44, %v1787_v58  ;;  %v613_v1 = vmul.f32 %v610_v44, %v1778_v45  ;;  %v716_v3 = vmul.f32 %v714_v0, %v1787_v58  ;;  %v717_v17 = vmul.f32 %v714_v0, %v1778_v45 }
  0xd7   : > { %482 = vrot.lane.b32.xlu1 %v477_v41, %s1547_s14  ;;  %s1563_s14 = smov 124  }
  0xd8   : > { %v655_v47 = vpop.permute.xlu1 %654  ;;  %v811_v11 = vpop.permute.xlu0 %810 }
  0xd9   : > { %584 = vrot.lane.b32.xlu0 %v580_v43, %s1552_s23  ;;  %v662_v52 = vrot.slane %v655_v47, %v1796_v6 }
  0xdb   : > { %508 = vrot.lane.b32.xlu1 %v503_v28, %s1549_s28  ;;  %v664_v55 = vmul.f32 %v662_v52, %v1787_v58  ;;  %v665_v39 = vmul.f32 %v662_v52, %v1778_v45  ;;  %s1565_s28 = smov 92  }
  0xdd   : > { %616 = vrot.lane.b32.xlu0 %v612_v48, %s1553_s25  ;;  %v681_v53 = vpop.permute.xlu1 %680  ;;  %v915_v21 = vpop.permute.xlu0 %914 }
  0xde   : > { %v688_v56 = vrot.slane %v681_v53, %v1796_v6  ;;  %v922_v25 = vrot.slane %v915_v21, %v1796_v6 }
  0xdf   : > { %534 = vrot.lane.b32.xlu1 %v529_v50, %s1550_s1  ;;  %s1566_s1 = smov 76  }
  0xe0   : > { %v690_v63 = vmul.f32 %v688_v56, %v1787_v58  ;;  %v818_v58 = vrot.slane %v811_v11, %v1796_v6  ;;  %v691_v14 = vmul.f32 %v688_v56, %v1778_v45  ;;  %v924_v45 = vmul.f32 %v922_v25, %v1792_v61 }
  0xe1   : > { %642 = vrot.lane.b32.xlu0 %v638_v51, %s1554_s22  ;;  %v925_v41 = vmul.f32 %v922_v25, %v911_v38 }
  0xe2   : > { %v759_v60 = vpop.permute.xlu1 %758  ;;  %v820_v15 = vmul.f32 %v818_v58, %v749_v2  ;;  %v821_v18 = vmul.f32 %v818_v58, %v1789_v59  ;;  %v993_v32 = vpop.permute.xlu0 %992 }
  0xe3   : > { %560 = vrot.lane.b32.xlu1 %v555_v54, %s1551_s27  ;;  %v766_v5 = vrot.slane %v759_v60, %v1796_v6  ;;  %v1000_v36 = vrot.slane %v993_v32, %v1796_v6 }
  0xe5   : > { %668 = vrot.lane.b32.xlu0 %v664_v55, %s1555_s29  ;;  %v768_v9 = vmul.f32 %v766_v5, %v749_v2  ;;  %v769_v23 = vmul.f32 %v766_v5, %v1789_v59  ;;  %v1002_v40 = vmul.f32 %v1000_v36, %v1792_v61  ;;  %v1003_v46 = vmul.f32 %v1000_v36, %v911_v38 }
  0xe7   : > { %586 = vrot.lane.b32.xlu1 %v581_v62, %s1552_s23  ;;  %v785_v8 = vpop.permute.xlu1 %784  ;;  %v321_v49 = vpop.permute.xlu0 %320 }
  0xe8   : > { %v792_v10 = vrot.slane %v785_v8, %v1796_v6 }
  0xe9   : > { %694 = vrot.lane.b32.xlu0 %v690_v63, %s1556_s30 }
  0xea   : > { %v794_v13 = vmul.f32 %v792_v10, %v749_v2  ;;  %v795_v26 = vmul.f32 %v792_v10, %v1789_v59 }
  0xeb   : > { %618 = vrot.lane.b32.xlu1 %v613_v1, %s1553_s25  ;;  %s1567_s25 = smov 60  }
  0xec   : > { %v837_v12 = vpop.permute.xlu1 %836 }
  0xed   : > { %720 = vrot.lane.b32.xlu0 %v716_v3, %s1557_s7  ;;  %v844_v4 = vrot.slane %v837_v12, %v1796_v6 }
  0xef   : > { %644 = vrot.lane.b32.xlu1 %v639_v34, %s1554_s22  ;;  %v846_v19 = vmul.f32 %v844_v4, %v749_v2  ;;  %v847_v33 = vmul.f32 %v844_v4, %v1789_v59  ;;  %s1218_s22 = sshll.u32 %s1703_s12, 3 }
  0xf1   : > { %772 = vrot.lane.b32.xlu0 %v768_v9, %s1558_s24  ;;  %v863_v16 = vpop.permute.xlu1 %862 }
  0xf2   : > { %v870_v20 = vrot.slane %v863_v16, %v1796_v6  ;;  %v328_v16 = vrot.slane %v321_v49, %v1796_v6 }
  0xf3   : > { %670 = vrot.lane.b32.xlu1 %v665_v39, %s1555_s29  ;;  %s1224_s29 = sshll.u32 %s1506_s18, 7 }
  0xf4   : > { %v872_v24 = vmul.f32 %v870_v20, %v749_v2  ;;  %v873_v37 = vmul.f32 %v870_v20, %v1789_v59 }
  0xf5   : > { %798 = vrot.lane.b32.xlu0 %v794_v13, %s1559_s8 }
  0xf6   : > { %v941_v22 = vpop.permute.xlu1 %940 }
  0xf7   : > { %696 = vrot.lane.b32.xlu1 %v691_v14, %s1556_s30  ;;  %v948_v27 = vrot.slane %v941_v22, %v1796_v6  ;;  %s283_s30 = scalar_lea.vmem [#allocation8], %s1218_s22 }
  0xf9   : > { %824 = vrot.lane.b32.xlu0 %v820_v15, %s1560_s9  ;;  %v950_v30 = vmul.f32 %v948_v27, %v1792_v61  ;;  %v951_v43 = vmul.f32 %v948_v27, %v911_v38 }
  0xfb   : > { %722 = vrot.lane.b32.xlu1 %v717_v17, %s1557_s7  ;;  %v967_v29 = vpop.permute.xlu1 %966  ;;  %s1077_s7 = sshll.u32 %s283_s30, 4  ;;  %s1078_s7 = int_to_ptr.vmem [resolvable:$true] %s1077_s7 }
  0xfc   : > { %v974_v31 = vrot.slane %v967_v29, %v1796_v6 }
  0xfd   : > { %850 = vrot.lane.b32.xlu0 %v846_v19, %s1561_s6 }
  0xfe   : > { %v976_v35 = vmul.f32 %v974_v31, %v1792_v61  ;;  %v977_v44 = vmul.f32 %v974_v31, %v911_v38 }
  0xff   : > { %774 = vrot.lane.b32.xlu1 %v769_v23, %s1558_s24 }
 0x100   : > { %v1019_v59 = vpop.permute.xlu1 %1018 }
 0x101   : > { %876 = vrot.lane.b32.xlu0 %v872_v24, %s1562_s10  ;;  %v1026_v47 = vrot.slane %v1019_v59, %v1796_v6  ;;  %v330_v24 = vmul.f32 %v328_v16, %v1800_v7 }
 0x103   : > { %800 = vrot.lane.b32.xlu1 %v795_v26, %s1559_s8  ;;  %v1028_v28 = vmul.f32 %v1026_v47, %v1792_v61  ;;  %v1029_v48 = vmul.f32 %v1026_v47, %v911_v38 }
 0x105   : > { %928 = vrot.lane.b32.xlu0 %v924_v45, %s1563_s14 }
 0x107   : > { %826 = vrot.lane.b32.xlu1 %v821_v18, %s1560_s9  ;;  %s1075_s9 = scalar_lea.hbm %s2029_s4, %s1224_s29 }
 0x109   : > { %954 = vrot.lane.b32.xlu0 %v950_v30, %s1564_s21 }
 0x10b   : > { %852 = vrot.lane.b32.xlu1 %v847_v33, %s1561_s6  ;;  %s1059_s6 = scalar_lea.sflag [#allocation5], %s1703_s12 }
 0x10d   : > { %980 = vrot.lane.b32.xlu0 %v976_v35, %s1565_s28 }
 0x10f   : > { %878 = vrot.lane.b32.xlu1 %v873_v37, %s1562_s10  ;;  %s1430_s10 = scalar_lea.vmem %s1078_s7, 128 }
 0x110   : > { %p1431_p1 = scmp.ne.s32.totalorder %s1078_s7, %s1430_s10 }
 0x111   : > { %1006 = vrot.lane.b32.xlu0 %v1002_v40, %s1566_s1 }
 0x112   : > { %p1432_p8 = pnand %p1431_p1, %p1680_p0 }
 0x113   : > { %930 = vrot.lane.b32.xlu1 %v925_v41, %s1563_s14  ;;  %s1568_s14 = smov [#allocation8]  }
 0x114   : > { %p1433_p13 = pneg %p1432_p8  ;;  %s1434_s18 = sshll.u32 %s1568_s14, 4  ;;  %s1435_s18 = int_to_ptr.vmem [resolvable:$false] %s1434_s18 }
 0x115   : > { %1046 = vperm.xlu0 %1374, %v1043_v42   ;;  %p1437_p11 = scmp.lt.s32.totalorder %s1078_s7, %s1435_s18 }
 0x117   : > { %956 = vrot.lane.b32.xlu1 %v951_v43, %s1564_s21  ;;  %s1436_s21 = scalar_lea.vmem %s1435_s18, 256 }
 0x118   : > { %p1438_p2 = scmp.lt.s32.totalorder %s1436_s21, %s1430_s10 }
 0x11a   : > { %p1439_p12 = por %p1438_p2, %p1437_p11 }
 0x11b   : > { %982 = vrot.lane.b32.xlu1 %v977_v44, %s1565_s28 }
 0x11c   : > { %p1440_p3 = pnand %p1439_p12, %p1433_p13 }
 0x11f   : > { %1008 = vrot.lane.b32.xlu1 %v1003_v46, %s1566_s1 }
 0x123   : > { %1032 = vrot.lane.b32.xlu1 %v1028_v28, %s1567_s25 }
 0x127   : > { %1034 = vrot.lane.b32.xlu1 %v1029_v48, %s1567_s25 }
 0x131   : > { %v350_v50 = vpop.permute.xlu1 %349  ;;  %v377_v51 = vpop.permute.xlu0 %376 }
 0x132   : > { %v353_v4 = vrot.slane %v350_v50, 4  ;;  %v380_v17 = vrot.slane %v377_v51, 4 }
 0x135   : > { %v352_v52 = vpop.permute.xlu1 %351 }
 0x136   : > { %v429_v53 = vpop.permute.xlu0 %428  ;;  %v354_v14 = vrot.slane %v352_v52, 4 }
 0x137   : > { %v432_v27 = vrot.slane %v429_v53, 4 }
 0x138   : > { %v356_v21 = vsel %vm355_vm1, %v353_v4, %v354_v14 }
 0x139   : > { %v379_v54 = vpop.permute.xlu1 %378  ;;  %v358_v26 = vsel %vm357_vm2, %v350_v50, %v356_v21  ;;  %vm805_vm2 = vcmask 891904  }
 0x13a   : > { %v381_v19 = vrot.slane %v379_v54, 4  ;;  %v360_v36 = vadd.f32 %v358_v26, %v330_v24 }
 0x13b   : > { %v1866_v55 = vpop.permute.xlu0 %480 }
 0x13c   : > { %v382_v25 = vsel %vm355_vm1, %v380_v17, %v381_v19  ;;  %v484_v33 = vrot.slane %v1866_v55, 4 }
 0x13d   : > { %v403_v56 = vpop.permute.xlu1 %402  ;;  %v384_v31 = vsel %vm383_vm3, %v377_v51, %v382_v25  ;;  %vm831_vm3 = vcmask 760832  }
 0x13e   : > { %v406_v45 = vrot.slane %v403_v56, 4  ;;  %v386_v38 = vadd.f32 %v384_v31, %v360_v36 }
 0x13f   : > { %v1868_v57 = vpop.permute.xlu0 %506 }
 0x140   : > { %v510_v42 = vrot.slane %v1868_v57, 4 }
 0x141   : > { %v405_v60 = vpop.permute.xlu1 %404 }
 0x142   : > { %v407_v23 = vrot.slane %v405_v60, 4 }
 0x143   : > { %v1870_v62 = vpop.permute.xlu0 %532 }
 0x144   : > { %v408_v32 = vsel %vm355_vm1, %v406_v45, %v407_v23  ;;  %v536_v44 = vrot.slane %v1870_v62, 4 }
 0x145   : > { %v431_v61 = vpop.permute.xlu1 %430  ;;  %v410_v40 = vsel %vm409_vm4, %v403_v56, %v408_v32  ;;  %vm857_vm4 = vcmask 629760  }
 0x146   : > { %v433_v29 = vrot.slane %v431_v61, 4  ;;  %v412_v28 = vadd.f32 %v410_v40, %v386_v38 }
 0x147   : > { %v1872_v63 = vpop.permute.xlu0 %558 }
 0x148   : > { %v434_v7 = vsel %vm355_vm1, %v432_v27, %v433_v29  ;;  %v562_v49 = vrot.slane %v1872_v63, 4 }
 0x149   : > { %v483_v0 = vpop.permute.xlu1 %482  ;;  %v436_v46 = vsel %vm435_vm5, %v429_v53, %v434_v7  ;;  %vm883_vm5 = vcmask 498688  }
 0x14a   : > { %v485_v35 = vrot.slane %v483_v0, 4  ;;  %v438_v54 = vadd.f32 %v436_v46, %v412_v28 }
 0x14b   : > { %v1874_v1 = vpop.permute.xlu0 %584 }
 0x14c   : > { %v486_v43 = vsel %vm355_vm1, %v484_v33, %v485_v35  ;;  %v588_v61 = vrot.slane %v1874_v1, 4 }
 0x14d   : > { %v509_v2 = vpop.permute.xlu1 %508  ;;  %v488_v51 = vsel %vm487_vm6, %v1866_v55, %v486_v43  ;;  %vm935_vm6 = vcmask 1014784  }
 0x14e   : > { %v511_v37 = vrot.slane %v509_v2, 4  ;;  %v490_v0 = vadd.f32 %v488_v51, %v438_v54 }
 0x14f   : > { %v1876_v3 = vpop.permute.xlu0 %616 }
 0x150   : > { %v512_v48 = vsel %vm355_vm1, %v510_v42, %v511_v37 }
 0x151   : > { %v535_v5 = vpop.permute.xlu1 %534  ;;  %v514_v60 = vsel %vm513_vm7, %v1868_v57, %v512_v48  ;;  %vm961_vm7 = vcmask 883712  }
 0x152   : > { %v537_v59 = vrot.slane %v535_v5, 4  ;;  %v620_v5 = vrot.slane %v1876_v3, 4  ;;  %v516_v16 = vadd.f32 %v514_v60, %v490_v0 }
 0x153   : > { %v1878_v8 = vpop.permute.xlu0 %642 }
 0x154   : > { %v538_v56 = vsel %vm355_vm1, %v536_v44, %v537_v59  ;;  %v646_v57 = vrot.slane %v1878_v8, 4 }
 0x155   : > { %v1880_v34 = vpop.permute.xlu1 %560 }
 0x156   : > { %v563_v50 = vrot.slane %v1880_v34, 4  ;;  %v540_v34 = vsel %vm539_vm8, %v1870_v62, %v538_v56  ;;  %vm987_vm8 = vcmask 752640  }
 0x157   : > { %v1882_v9 = vpop.permute.xlu0 %668  ;;  %v542_v21 = vadd.f32 %v540_v34, %v516_v16 }
 0x158   : > { %v564_v2 = vsel %vm355_vm1, %v562_v49, %v563_v50  ;;  %v672_v24 = vrot.slane %v1882_v9, 4 }
 0x159   : > { %v1884_v10 = vpop.permute.xlu1 %586  ;;  %v566_v19 = vsel %vm565_vm9, %v1872_v63, %v564_v2  ;;  %vm1013_vm9 = vcmask 621568  }
 0x15a   : > { %v589_v53 = vrot.slane %v1884_v10, 4  ;;  %v568_v26 = vadd.f32 %v566_v19, %v542_v21 }
 0x15b   : > { %v1886_v11 = vpop.permute.xlu0 %694 }
 0x15c   : > { %v590_v10 = vsel %vm355_vm1, %v588_v61, %v589_v53  ;;  %v698_v27 = vrot.slane %v1886_v11, 4 }
 0x15d   : > { %v1888_v12 = vpop.permute.xlu1 %618  ;;  %v592_v62 = vsel %vm591_vm10, %v1874_v1, %v590_v10  ;;  %vm1039_vm10 = vcmask 490496  }
 0x15e   : > { %v621_v55 = vrot.slane %v1888_v12, 4  ;;  %v594_v31 = vadd.f32 %v592_v62, %v568_v26 }
 0x15f   : > { %v1890_v39 = vpop.permute.xlu0 %720 }
 0x160   : > { %v622_v23 = vsel %vm355_vm1, %v620_v5, %v621_v55  ;;  %v724_v1 = vrot.slane %v1890_v39, 4 }
 0x161   : > { %v1892_v13 = vpop.permute.xlu1 %644  ;;  %v624_v63 = vsel %vm623_vm11, %v1876_v3, %v622_v23 }
 0x162   : > { %v647_v17 = vrot.slane %v1892_v13, 4  ;;  %v626_v36 = vadd.f32 %v624_v63, %v594_v31 }
 0x163   : > { %v1894_v58 = vpop.permute.xlu0 %772 }
 0x164   : > { %v648_v45 = vsel %vm355_vm1, %v646_v57, %v647_v17  ;;  %v776_v37 = vrot.slane %v1894_v58, 4 }
 0x165   : > { %v1896_v15 = vpop.permute.xlu1 %670  ;;  %v650_v33 = vsel %vm649_vm12, %v1878_v8, %v648_v45 }
 0x166   : > { %v673_v12 = vrot.slane %v1896_v15, 4  ;;  %v652_v38 = vadd.f32 %v650_v33, %v626_v36 }
 0x167   : > { %v1899_v20 = vpop.permute.xlu0 %798 }
 0x168   : > { %v674_v15 = vsel %vm355_vm1, %v672_v24, %v673_v12  ;;  %v802_v42 = vrot.slane %v1899_v20, 4 }
 0x169   : > { %v1902_v22 = vpop.permute.xlu1 %696  ;;  %v676_v3 = vsel %vm675_vm13, %v1882_v9, %v674_v15 }
 0x16a   : > { %v699_v13 = vrot.slane %v1902_v22, 4  ;;  %v678_v59 = vadd.f32 %v676_v3, %v652_v38 }
 0x16b   : > { %v1908_v30 = vpop.permute.xlu0 %824 }
 0x16c   : > { %v700_v7 = vsel %vm355_vm1, %v698_v27, %v699_v13  ;;  %v828_v9 = vrot.slane %v1908_v30, 4 }
 0x16d   : > { %v1906_v18 = vpop.permute.xlu1 %722  ;;  %v702_v8 = vsel %vm701_vm14, %v1886_v11, %v700_v7 }
 0x16e   : > { %v725_v32 = vrot.slane %v1906_v18, 4  ;;  %v704_v48 = vadd.f32 %v702_v8, %v678_v59 }
 0x16f   : > { %v1918_v47 = vpop.permute.xlu0 %850 }
 0x170   : > { %v726_v40 = vsel %vm355_vm1, %v724_v1, %v725_v32  ;;  %v854_v11 = vrot.slane %v1918_v47, 4 }
 0x171   : > { %v1913_v41 = vpop.permute.xlu1 %774  ;;  %v728_v28 = vsel %vm727_vm15, %v1890_v39, %v726_v40 }
 0x172   : > { %v777_v22 = vrot.slane %v1913_v41, 4  ;;  %v730_v54 = vadd.f32 %v728_v28, %v704_v48 }
 0x173   : > { %v1934_v4 = vpop.permute.xlu0 %876 }
 0x174   : > { %v778_v41 = vsel %vm355_vm1, %v776_v37, %v777_v22  ;;  %v880_v53 = vrot.slane %v1934_v4, 4 }
 0x175   : > { %v1924_v52 = vpop.permute.xlu1 %800  ;;  %v780_v51 = vsel %vm779_vm0, %v1894_v58, %v778_v41 }
 0x176   : > { %v803_v18 = vrot.slane %v1924_v52, 4  ;;  %v782_v0 = vadd.f32 %v780_v51, %v730_v54 }
 0x177   : > { %v1948_v29 = vpop.permute.xlu0 %928 }
 0x178   : > { %v804_v49 = vsel %vm355_vm1, %v802_v42, %v803_v18  ;;  %v932_v5 = vrot.slane %v1948_v29, 4 }
 0x179   : > { %v827_v14 = vpop.permute.xlu1 %826  ;;  %v806_v61 = vsel %vm805_vm2, %v1899_v20, %v804_v49 }
 0x17a   : > { %v829_v46 = vrot.slane %v827_v14, 4  ;;  %v808_v14 = vadd.f32 %v806_v61, %v782_v0 }
 0x17b   : > { %v955_v43 = vpop.permute.xlu0 %954 }
 0x17c   : > { %v830_v56 = vsel %vm355_vm1, %v828_v9, %v829_v46  ;;  %v958_v17 = vrot.slane %v955_v43, 4 }
 0x17d   : > { %v853_v25 = vpop.permute.xlu1 %852  ;;  %v832_v55 = vsel %vm831_vm3, %v1908_v30, %v830_v56 }
 0x17e   : > { %v855_v50 = vrot.slane %v853_v25, 4  ;;  %v834_v20 = vadd.f32 %v832_v55, %v808_v14 }
 0x17f   : > { %v981_v39 = vpop.permute.xlu0 %980 }
 0x180   : > { %v856_v2 = vsel %vm355_vm1, %v854_v11, %v855_v50  ;;  %v984_v21 = vrot.slane %v981_v39, 4 }
 0x181   : > { %v879_v35 = vpop.permute.xlu1 %878  ;;  %v858_v57 = vsel %vm857_vm4, %v1918_v47, %v856_v2 }
 0x182   : > { %v881_v60 = vrot.slane %v879_v35, 4  ;;  %v860_v24 = vadd.f32 %v858_v57, %v834_v20 }
 0x183   : > { %v1007_v62 = vpop.permute.xlu0 %1006 }
 0x184   : > { %v882_v16 = vsel %vm355_vm1, %v880_v53, %v881_v60  ;;  %v1010_v26 = vrot.slane %v1007_v62, 4 }
 0x185   : > { %v931_v44 = vpop.permute.xlu1 %930  ;;  %v884_v12 = vsel %vm883_vm5, %v1934_v4, %v882_v16 }
 0x186   : > { %v933_v58 = vrot.slane %v931_v44, 4  ;;  %v886_v27 = vadd.f32 %v884_v12, %v860_v24 }
 0x188   : > { %v934_v19 = vsel %vm355_vm1, %v932_v5, %v933_v58 }
 0x189   : > { %v957_v52 = vpop.permute.xlu1 %956  ;;  %v936_v47 = vsel %vm935_vm6, %v1948_v29, %v934_v19 }
 0x18a   : > { %v959_v10 = vrot.slane %v957_v52, 4  ;;  %v938_v15 = vadd.f32 %v936_v47, %v886_v27 }
 0x18c   : > { %v960_v25 = vsel %vm355_vm1, %v958_v17, %v959_v10 }
 0x18d   : > { %v983_v34 = vpop.permute.xlu1 %982  ;;  %v962_v63 = vsel %vm961_vm7, %v955_v43, %v960_v25 }
 0x18e   : > { %v985_v23 = vrot.slane %v983_v34, 4  ;;  %v964_v32 = vadd.f32 %v962_v63, %v938_v15 }
 0x190   : > { %v986_v13 = vsel %vm355_vm1, %v984_v21, %v985_v23  ;;  %v1047_v22 = vpop.permute.xlu0 %1046 }
 0x191   : > { %v1009_v30 = vpop.permute.xlu1 %1008  ;;  %v988_v1 = vsel %vm987_vm8, %v981_v39, %v986_v13  ;;  %v1054_v40 = vrot.slane %v1047_v22, %v1796_v6 }
 0x192   : > { %v1011_v45 = vrot.slane %v1009_v30, 4  ;;  %v990_v36 = vadd.f32 %v988_v1, %v964_v32 }
 0x194   : > { %v1012_v4 = vsel %vm355_vm1, %v1010_v26, %v1011_v45 }
 0x195   : > { %v1033_v31 = vpop.permute.xlu1 %1032  ;;  %v1014_v33 = vsel %vm1013_vm9, %v1007_v62, %v1012_v4 }
 0x196   : > { %v1036_v7 = vrot.slane %v1033_v31, 4  ;;  %v1016_v3 = vadd.f32 %v1014_v33, %v990_v36 }
 0x199   : > { %v1035_v35 = vpop.permute.xlu1 %1034 }
 0x19a   : > { %v1037_v29 = vrot.slane %v1035_v35, 4 }
 0x19c   : > { %v1038_v37 = vsel %vm355_vm1, %v1036_v7, %v1037_v29 }
 0x19d   : > { %v1040_v38 = vsel %vm1039_vm10, %v1033_v31, %v1038_v37 }
 0x19e   : > { %v1042_v42 = vadd.f32 %v1040_v38, %v1016_v3 }
 0x1a0   : > { %v1056_v18 = vadd.f32 %v1054_v40, %v1042_v42 }
 0x1a2   : > { %1057 = vst [vmem:[%s283_s30] sm:$0xff] %v1056_v18 }
 0x1a3   : > { %1443 = shalt.err (!%p1440_p3)
}
 0x1a4   : > { %s1444_s28 = scalar_lea.hbm %s1075_s9, 128  ;;  %s1448_s27 = scalar_lea.hbm %s2029_s4, 256 }
 0x1a5   : > { %p1445_p5 = scmp.ne.s32.totalorder %s1075_s9, %s1444_s28  ;;  %p1449_p4 = scmp.lt.s32.totalorder %s1075_s9, %s2029_s4 }
 0x1a6   : > { %p1450_p9 = scmp.lt.s32.totalorder %s1448_s27, %s1444_s28 }
 0x1a7   : > { %p1446_p7 = pnand %p1445_p5, %p1680_p0 }
 0x1a8   : > { %p1451_p10 = por %p1450_p9, %p1449_p4 }
 0x1a9   : > { %p1447_p6 = pneg %p1446_p7 }
 0x1ab   : > { %p1452_p1 = pnand %p1451_p10, %p1447_p6 }
 0x1ad   : > { %1455 = shalt.err (!%p1452_p1)
}
 0x1ae   : > { %1234 = dma.vmem_to_hbm [thread:$0]  (%p1680_p0), %s1078_s7, 128, %s1075_s9, %s1059_s6  }
 0x1af PF: > { %s1089_s22 = sand.u32 1, %s1494_s15   ;;  %p2042_p8 = scmp.ne.s32.totalorder %s2035_s26, 0 }
 0x1b0   : > { %p2043_p13 = scmp.ge.s32.totalorder %s1514_s20, 2  ;;  %s1090_s29 = scalar_lea.sflag [#allocation5], %s1089_s22 }
 0x1b2   : > { %p1245_p11 = pnand %p2043_p13, %p2042_p8 }
 0x1b4   : > { %p1246_p2 = pneg %p1245_p11 }
 0x1b6   : > { %1489 = dma.done.wait (%p1246_p2), %s1090_s29, 128  }
 0x1b7   : > { %1491 = vsyncadd (%p1246_p2), %s1090_s29, 4294967168  ;;  %s21_s20 = sadd.s32 1, %s1514_s20   ;;  %s2044_s15 = smov %s1498_s16 }
 0x1b8   : > { %p18_p12 = scmp.ge.s32.totalorder %s21_s20, 4   ;;  %s2045_s16 = smov %s1502_s17 }
 0x1b9   : > { %s2046_s17 = smov %s1686_s13  ;;  %s2047_s18 = smov %s1510_s19 }
 0x1ba   : > { %s2048_s19 = smov %s2050_s5  ;;  %20 = sbr.rel (!%p18_p12) target bundleno = 9 (0x9), region = 94 }
 0x1bf   :  { %1095 = vsyncpa [#allocation4], 1 }
 0x1c0   :  { %1097 = vsyncpa [#allocation4 + $0x1], 1 }
 0x1c1   :  { %1098 = vsyncpa [#allocation7], 1 }
 0x1c2   :  { %1099 = vsyncpa [#allocation5], 1 }
 0x1c3   :  { %1101 = vsyncpa [#allocation5 + $0x1], 1 }

</bundles_post_ra>
